<compile_context>
chip_gen: v7x
topology: tpu7x:2x2x1
jax: 0.10.0
libtpu: 0.0.40
codegen_flags: <defaults>
</compile_context>

<pallas_src>
import jax
import jax.numpy as jnp
from jax.experimental import pallas as pl
from jax.experimental.pallas import tpu as pltpu


def _round_up(x, m):
    return (x + m - 1) // m * m


_VMEM_BUDGET = None


def _vmem_budget_bytes():
    """Half of the detected per-core VMEM capacity (generation-aware)."""
    global _VMEM_BUDGET
    if _VMEM_BUDGET is None:
        cap = 64 * 1024 * 1024            # v7x per-TC capacity; safe lower bound
        try:
            cap = int(getattr(pltpu.get_tpu_info(), "vmem_capacity_bytes", cap))
        except Exception:
            pass
        _VMEM_BUDGET = max(cap // 2, 16 * 1024 * 1024)
    return _VMEM_BUDGET


def _plan_batch_tiling(B, S, H_pad, A, budget_bytes):
    """Returns (B_pad, tile_b, num_tiles)."""
    if B <= 128:
        # Latency path (act() uses B=1): single full-array block, batch padded
        # only to the sublane grain rather than 128.
        b_pad = _round_up(max(B, 1), 16)
        return b_pad, b_pad, 1
    # Throughput path: biggest 128-aligned tile within the VMEM budget, capped
    # at ceil(B/2) so there are always >= 2 grid steps on the "parallel" axis
    # (uses v7x's two TensorCores; harmless on v5e/v6e).
    resident = 2 * ((S * H_pad + H_pad * A) * 2 + (H_pad + A) * 4)  # dbl-buffered weights/biases
    max_tile = _round_up((B + 1) // 2, 128)
    tile_b = 128
    for cand in (2048, 1024, 512, 256, 128):
        if cand > max_tile:
            continue
        per_tile = 2 * cand * S * 4          # f32 state tile, double-buffered
        per_tile += 2 * cand * A * 4         # q output tile, double-buffered
        per_tile += 4 * cand * 4             # max/argmax output tiles
        per_tile += 3 * cand * H_pad * 4     # live intermediates (h f32, h bf16, slack)
        if resident + per_tile <= budget_bytes:
            tile_b = cand
            break
    b_pad = _round_up(B, tile_b)
    return b_pad, tile_b, b_pad // tile_b


def _dqn_kernel(x_ref, w1_ref, b1_ref, w2_ref, b2_ref, q_ref, maxv_ref, amax_ref):
    # Fused MLP Q-head + max/argmax over actions for one batch tile.
    #   x:  (TB, S)     f32   (cast to bf16 here -- VPU has slack, saves a wrapper pass)
    #   w1: (S, H_pad)  bf16, b1: (1, H_pad) f32
    #   w2: (H_pad, A)  bf16, b2: (1, A)     f32
    x = x_ref[...].astype(jnp.bfloat16)
    h = jnp.dot(x, w1_ref[...], preferred_element_type=jnp.float32)
    h = jnp.maximum(h + b1_ref[...], 0.0)                           # (TB, H_pad) f32
    q = jnp.dot(h.astype(jnp.bfloat16), w2_ref[...],
                preferred_element_type=jnp.float32) + b2_ref[...]    # (TB, A) f32
    q_ref[...] = q                                                   # only real action columns hit HBM

    # max / argmax along the lane (action) axis -- no full-tile transpose.
    m = jnp.max(q, axis=-1, keepdims=True)                           # (TB, 1)
    maxv_ref[...] = m
    num_a = q.shape[-1]
    iota = jax.lax.broadcasted_iota(jnp.int32, q.shape, 1)
    # torch.max(q, dim=1) index semantics: first index on ties.
    amax_ref[...] = jnp.min(jnp.where(q == m, iota, num_a),
                            axis=-1, keepdims=True).astype(jnp.int32)


def prepare_dqn_params(w1, b1, w2, b2):
    """One-time packing of the Q-head parameters (do this outside the per-call
    forward path): pad the hidden dim to the 128-lane grain, cast to bf16."""
    S, H = w1.shape
    A = w2.shape[1]
    H_pad = _round_up(H, 128)
    w1p = jnp.zeros((S, H_pad), jnp.bfloat16).at[:, :H].set(w1.astype(jnp.bfloat16))
    b1p = jnp.zeros((1, H_pad), jnp.float32).at[:, :H].set(
        jnp.reshape(b1, (1, H)).astype(jnp.float32))
    w2p = jnp.zeros((H_pad, A), jnp.bfloat16).at[:H, :].set(w2.astype(jnp.bfloat16))
    b2p = jnp.reshape(b2, (1, A)).astype(jnp.float32)
    return w1p, b1p, w2p, b2p


@jax.jit
def dqn_forward_and_reduce(state, w1p, b1p, w2p, b2p):
    """Q(state) plus the base-class reductions, in one fused pass.

    Returns (q_values (B, A) f32, max_values (B,) f32, argmax_indices (B,) i32),
    i.e. forward(), max_over_actions() and argmax_over_actions().
    """
    B, S = state.shape
    H_pad = w1p.shape[1]
    A = w2p.shape[1]

    budget = _vmem_budget_bytes()
    B_pad, tile_b, num_tiles = _plan_batch_tiling(B, S, H_pad, A, budget)

    # Pad only the batch edge; no feature padding, no wrapper-side dtype cast.
    x = state if B_pad == B else jnp.pad(state, ((0, B_pad - B), (0, 0)))

    flops = 2 * B_pad * H_pad * (S + A)
    bytes_accessed = (B_pad * S * 4                      # state stream (f32)
                      + (S * H_pad + H_pad * A) * 2      # bf16 weights (resident)
                      + (H_pad + A) * 4                  # f32 biases
                      + B_pad * A * 4                    # q writeback
                      + B_pad * (4 + 4))                 # max + argmax

    q, maxv, amax = pl.pallas_call(
        _dqn_kernel,
        out_shape=(
            jax.ShapeDtypeStruct((B_pad, A), jnp.float32),
            jax.ShapeDtypeStruct((B_pad, 1), jnp.float32),
            jax.ShapeDtypeStruct((B_pad, 1), jnp.int32),
        ),
        grid_spec=pl.GridSpec(
            grid=(num_tiles,),
            in_specs=[
                pl.BlockSpec((tile_b, S), lambda i: (i, 0)),     # state tile (streams)
                # Resident weights/biases: constant index_map -> DMA'd once,
                # stay in VMEM.  (For very large H on v7x these could also be
                # single-buffered via pipeline_mode=pl.Buffered(1).)
                pl.BlockSpec((S, H_pad), lambda i: (0, 0)),      # W1
                pl.BlockSpec((1, H_pad), lambda i: (0, 0)),      # b1
                pl.BlockSpec((H_pad, A), lambda i: (0, 0)),      # W2
                pl.BlockSpec((1, A), lambda i: (0, 0)),          # b2
            ],
            out_specs=(
                pl.BlockSpec((tile_b, A), lambda i: (i, 0)),     # q (real actions only)
                pl.BlockSpec((tile_b, 1), lambda i: (i, 0)),     # max values
                pl.BlockSpec((tile_b, 1), lambda i: (i, 0)),     # argmax indices
            ),
        ),
        compiler_params=pltpu.CompilerParams(
            dimension_semantics=("parallel",),
            vmem_limit_bytes=budget),
        cost_estimate=pl.CostEstimate(
            flops=flops, transcendentals=0, bytes_accessed=bytes_accessed),
    )(x, w1p, b1p, w2p, b2p)

    return q[:B], maxv[:B, 0], amax[:B, 0]


def _reference(state, w1, b1, w2, b2):
    # Matches the kernel's numerics: bf16 MXU inputs, f32 accumulation.
    h = jnp.dot(state.astype(jnp.bfloat16), w1.astype(jnp.bfloat16),
                preferred_element_type=jnp.float32)
    h = jnp.maximum(h + jnp.reshape(b1, (1, -1)).astype(jnp.float32), 0.0)
    q = jnp.dot(h.astype(jnp.bfloat16), w2.astype(jnp.bfloat16),
                preferred_element_type=jnp.float32) + jnp.reshape(b2, (1, -1))
    return q, jnp.max(q, axis=1), jnp.argmax(q, axis=1)


if __name__ == "__main__":
    # Small shapes consistent with a DQN MLP: flat state features, few actions.
    B, S, H, A = 8, 32, 64, 4

    key = jax.random.PRNGKey(0)
    k_x, k_w1, k_b1, k_w2, k_b2 = jax.random.split(key, 5)
    state = jax.random.normal(k_x, (B, S), dtype=jnp.float32)
    w1 = jax.random.normal(k_w1, (S, H), dtype=jnp.float32) * 0.1
    b1 = jax.random.normal(k_b1, (1, H), dtype=jnp.float32) * 0.1
    w2 = jax.random.normal(k_w2, (H, A), dtype=jnp.float32) * 0.1
    b2 = jax.random.normal(k_b2, (1, A), dtype=jnp.float32) * 0.1

    params = prepare_dqn_params(w1, b1, w2, b2)          # one-time packing
    q, max_vals, argmax_idx = dqn_forward_and_reduce(state, *params)
    jax.block_until_ready((q, max_vals, argmax_idx))

    q_ref, max_ref, arg_ref = _reference(state, w1, b1, w2, b2)
    assert q.shape == (B, A) and max_vals.shape == (B,) and argmax_idx.shape == (B,)
    assert jnp.allclose(q, q_ref, atol=1e-2, rtol=1e-2)
    assert jnp.allclose(max_vals, max_ref, atol=1e-2, rtol=1e-2)
    assert jnp.array_equal(argmax_idx, arg_ref.astype(jnp.int32))

    print("KERNEL_OK")
</pallas_src>

<mosaic_0001>
module attributes {stable_mosaic.version = 11 : i64} {
  func.func @_dqn_kernel(%arg0: i32, %arg1: memref<16x32xf32, #tpu.memory_space<vmem>>, %arg2: memref<32x128xbf16, #tpu.memory_space<vmem>>, %arg3: memref<1x128xf32, #tpu.memory_space<vmem>>, %arg4: memref<128x4xbf16, #tpu.memory_space<vmem>>, %arg5: memref<1x4xf32, #tpu.memory_space<vmem>>, %arg6: memref<16x4xf32, #tpu.memory_space<vmem>>, %arg7: memref<16x1xf32, #tpu.memory_space<vmem>>, %arg8: memref<16x1xi32, #tpu.memory_space<vmem>>) attributes {dimension_semantics = [#tpu.dimension_semantics<parallel>], iteration_bounds = array<i64: 1>, scalar_prefetch = 0 : i64, scratch_operands = 0 : i64, tpu.core_type = #tpu.core_type<tc>, window_params = [{transform_indices = @transform_0, window_bounds = array<i64: 16, 32>}, {pipeline_mode = #tpu.pipeline_mode<synchronous>, transform_indices = @transform_1, window_bounds = array<i64: 32, 128>}, {pipeline_mode = #tpu.pipeline_mode<synchronous>, transform_indices = @transform_2, window_bounds = array<i64: 1, 128>}, {pipeline_mode = #tpu.pipeline_mode<synchronous>, transform_indices = @transform_3, window_bounds = array<i64: 128, 4>}, {pipeline_mode = #tpu.pipeline_mode<synchronous>, transform_indices = @transform_4, window_bounds = array<i64: 1, 4>}, {transform_indices = @transform_5, window_bounds = array<i64: 16, 4>}, {transform_indices = @transform_6, window_bounds = array<i64: 16, 1>}, {transform_indices = @transform_7, window_bounds = array<i64: 16, 1>}]} {
    %c0 = arith.constant 0 : index
    %c0_0 = arith.constant 0 : index
    %0 = vector.load %arg1[%c0, %c0_0] : memref<16x32xf32, #tpu.memory_space<vmem>>, vector<16x32xf32>
    %1 = arith.truncf %0 : vector<16x32xf32> to vector<16x32xbf16>
    %c0_1 = arith.constant 0 : index
    %c0_2 = arith.constant 0 : index
    %2 = vector.load %arg2[%c0_1, %c0_2] : memref<32x128xbf16, #tpu.memory_space<vmem>>, vector<32x128xbf16>
    %cst = arith.constant dense<0.000000e+00> : vector<16x128xf32>
    %3 = tpu.matmul %1, %2, %cst {dimension_numbers = #tpu.dot_dimension_numbers<[1], [0], [0], [1], [0, 0, 1, 1], [], []>} : vector<16x32xbf16>, vector<32x128xbf16>, vector<16x128xf32> -> vector<16x128xf32>
    %c0_3 = arith.constant 0 : index
    %c0_4 = arith.constant 0 : index
    %4 = vector.load %arg3[%c0_3, %c0_4] : memref<1x128xf32, #tpu.memory_space<vmem>>, vector<1x128xf32>
    %5 = vector.broadcast %4 : vector<1x128xf32> to vector<16x128xf32>
    %6 = arith.addf %3, %5 : vector<16x128xf32>
    %cst_5 = arith.constant 0.000000e+00 : f32
    %7 = vector.broadcast %cst_5 : f32 to vector<16x128xf32>
    %8 = arith.maximumf %6, %7 : vector<16x128xf32>
    %9 = arith.truncf %8 : vector<16x128xf32> to vector<16x128xbf16>
    %c0_6 = arith.constant 0 : index
    %c0_7 = arith.constant 0 : index
    %10 = vector.load %arg4[%c0_6, %c0_7] : memref<128x4xbf16, #tpu.memory_space<vmem>>, vector<128x4xbf16>
    %cst_8 = arith.constant dense<0.000000e+00> : vector<16x4xf32>
    %11 = tpu.matmul %9, %10, %cst_8 {dimension_numbers = #tpu.dot_dimension_numbers<[1], [0], [0], [1], [0, 0, 1, 1], [], []>} : vector<16x128xbf16>, vector<128x4xbf16>, vector<16x4xf32> -> vector<16x4xf32>
    %c0_9 = arith.constant 0 : index
    %c0_10 = arith.constant 0 : index
    %12 = vector.load %arg5[%c0_9, %c0_10] : memref<1x4xf32, #tpu.memory_space<vmem>>, vector<1x4xf32>
    %13 = vector.broadcast %12 : vector<1x4xf32> to vector<16x4xf32>
    %14 = arith.addf %11, %13 : vector<16x4xf32>
    %c0_11 = arith.constant 0 : index
    %c0_12 = arith.constant 0 : index
    %15 = vector.load %arg6[%c0_11, %c0_12] : memref<16x4xf32, #tpu.memory_space<vmem>>, vector<16x4xf32>
    tpu.vector_store %arg6[%c0_11, %c0_12], %14 {strides = array<i32>} : memref<16x4xf32, #tpu.memory_space<vmem>>, vector<16x4xf32>,
    %cst_13 = arith.constant dense<0xFF800000> : vector<16xf32>
    %16 = vector.multi_reduction <maximumf>, %14, %cst_13 [1] : vector<16x4xf32> to vector<16xf32>
    %17 = vector.shape_cast %16 : vector<16xf32> to vector<16x1xf32>
    %c0_14 = arith.constant 0 : index
    %c0_15 = arith.constant 0 : index
    %18 = vector.load %arg7[%c0_14, %c0_15] : memref<16x1xf32, #tpu.memory_space<vmem>>, vector<16x1xf32>
    tpu.vector_store %arg7[%c0_14, %c0_15], %17 {strides = array<i32>} : memref<16x1xf32, #tpu.memory_space<vmem>>, vector<16x1xf32>,
    %19 = tpu.iota {dimensions = array<i32: 1>} : vector<16x4xi32>
    %20 = vector.broadcast %17 : vector<16x1xf32> to vector<16x4xf32>
    %21 = arith.cmpf oeq, %14, %20 : vector<16x4xf32>
    %c4_i32 = arith.constant 4 : i32
    %22 = vector.broadcast %c4_i32 : i32 to vector<16x4xi32>
    %23 = arith.select %21, %19, %22 : vector<16x4xi1>, vector<16x4xi32>
    %cst_16 = arith.constant dense<2147483647> : vector<16xi32>
    %24 = vector.multi_reduction <minsi>, %23, %cst_16 [1] : vector<16x4xi32> to vector<16xi32>
    %25 = vector.shape_cast %24 : vector<16xi32> to vector<16x1xi32>
    %c0_17 = arith.constant 0 : index
    %c0_18 = arith.constant 0 : index
    %26 = vector.load %arg8[%c0_17, %c0_18] : memref<16x1xi32, #tpu.memory_space<vmem>>, vector<16x1xi32>
    tpu.vector_store %arg8[%c0_17, %c0_18], %25 {strides = array<i32>} : memref<16x1xi32, #tpu.memory_space<vmem>>, vector<16x1xi32>,
    return
  }
  func.func @transform_0(%arg0: i32) -> (i32, i32) {
    %c0_i32 = arith.constant 0 : i32
    %c0_i32_0 = arith.constant 0 : i32
    return %arg0, %c0_i32 : i32, i32
  }
  func.func @transform_1(%arg0: i32) -> (i32, i32) {
    %c0_i32 = arith.constant 0 : i32
    %c0_i32_0 = arith.constant 0 : i32
    %c0_i32_1 = arith.constant 0 : i32
    return %c0_i32, %c0_i32_0 : i32, i32
  }
  func.func @transform_2(%arg0: i32) -> (i32, i32) {
    %c0_i32 = arith.constant 0 : i32
    %c0_i32_0 = arith.constant 0 : i32
    %c0_i32_1 = arith.constant 0 : i32
    return %c0_i32, %c0_i32_0 : i32, i32
  }
  func.func @transform_3(%arg0: i32) -> (i32, i32) {
    %c0_i32 = arith.constant 0 : i32
    %c0_i32_0 = arith.constant 0 : i32
    %c0_i32_1 = arith.constant 0 : i32
    return %c0_i32, %c0_i32_0 : i32, i32
  }
  func.func @transform_4(%arg0: i32) -> (i32, i32) {
    %c0_i32 = arith.constant 0 : i32
    %c0_i32_0 = arith.constant 0 : i32
    %c0_i32_1 = arith.constant 0 : i32
    return %c0_i32, %c0_i32_0 : i32, i32
  }
  func.func @transform_5(%arg0: i32) -> (i32, i32) {
    %c0_i32 = arith.constant 0 : i32
    %c0_i32_0 = arith.constant 0 : i32
    return %arg0, %c0_i32 : i32, i32
  }
  func.func @transform_6(%arg0: i32) -> (i32, i32) {
    %c0_i32 = arith.constant 0 : i32
    %c0_i32_0 = arith.constant 0 : i32
    return %arg0, %c0_i32 : i32, i32
  }
  func.func @transform_7(%arg0: i32) -> (i32, i32) {
    %c0_i32 = arith.constant 0 : i32
    %c0_i32_0 = arith.constant 0 : i32
    return %arg0, %c0_i32 : i32, i32
  }
}

</mosaic_0001>

<bundles_post_ra>
// kernel: dqn_forward_and_reduce.1
= control target key start
LH: loop header
LB: loop body
LE: loop exit
PB: predicated region body
PF: predicated region fallthrough
CT: control target
= control target key end

     0   :  { %v337_v0 = vmov 0.0   ;;  %vm338_vm0 = vmmov 0   ;;  %vm50_vm1 = vcmask 261120   ;;  %vm210_vm2 = vcmask 31744   ;;  %s449_s1 = inlined_call_operand.vmem [shape: bf16[32,128], index: 1, kind: input, shape index: {}]   ;;  %s450_s0 = inlined_call_operand.vmem [shape: f32[16,32], index: 0, kind: input, shape index: {}]   ;;  %s451_s3 = inlined_call_operand.vmem [shape: bf16[128,4], index: 3, kind: input, shape index: {}]   ;;  %s452_s2 = inlined_call_operand.vmem [shape: f32[1,128], index: 2, kind: input, shape index: {}]   ;;  %s453_s4 = inlined_call_operand.vmem [shape: f32[1,4], index: 4, kind: input, shape index: {}]   ;;  %s454_s5 = inlined_call_operand.vmem [shape: f32[16,4], index: 5, kind: output, shape index: {0}]   ;;  %s455_s6 = inlined_call_operand.vmem [shape: f32[16,1], index: 6, kind: output, shape index: {1}]   ;;  %s456_s7 = inlined_call_operand.vmem [shape: s32[16,1], index: 7, kind: output, shape index: {2}]  }
   0x1   :  { %297 = vmatprep.subr.bf16.mxu0 %v337_v0  ;;  %v327_v1 = vld [vmem:[%s449_s1] sm:$0xff]   ;;  %301 = vmatprep.mubr.msk.bf16.mxu0 %vm338_vm0, %v337_v0  ;;  %v328_v2 = vld [vmem:[%s449_s1 + $0x8] sm:$0xff]   ;;  %v331_v8 = vld [vmem:[%s451_s3 + $0x10] sm:$0xff]   ;;  %v222_v33 = vlaneseq  ;;  %vm219_vm3 = vcmask 7168  }
   0x2   :  { %305 = vmatprep.subr.bf16.mxu1 %v337_v0  ;;  %321 = vmatprep.mubr.msk.bf16.mxu1 %vm338_vm0, %v337_v0  ;;  %v24_v3 = vld [vmem:[%s450_s0] sm:$0xff]  ;;  %v25_v4 = vld [vmem:[%s450_s0 + $0x8] sm:$0xff]  ;;  %v332_v9 = vld [vmem:[%s451_s3 + $0x18] sm:$0xff]  }
   0x3   :  { %298 = vmatpush3.bf16.msra.mxu0 %v327_v1  ;;  %v329_v5 = vld [vmem:[%s451_s3] sm:$0xff]   ;;  %v26_v6 = vpack.c.bf16 %v25_v4, %v24_v3  ;;  %v330_v7 = vld [vmem:[%s451_s3 + $0x8] sm:$0xff]   ;;  %v335_v12 = vld [vmem:[%s451_s3 + $0x30] sm:$0xff]   ;;  %v223_v34 = vand.u32 127, %v222_v33 }
   0x4   :  { %299 = vmatprep.subr.bf16.mxu0 %v337_v0  ;;  %306 = vmatpush3.bf16.msra.mxu1 %v329_v5  ;;  %v333_v10 = vld [vmem:[%s451_s3 + $0x20] sm:$0xff]   ;;  %v334_v11 = vld [vmem:[%s451_s3 + $0x28] sm:$0xff]   ;;  %v336_v13 = vld [vmem:[%s451_s3 + $0x38] sm:$0xff]  }
   0x5   :  { %307 = vmatprep.subr.bf16.mxu1 %v337_v0  ;;  %v272_v14 = vld [vmem:[%s452_s2] ss:$0 sm:$0xff] }
   0x6   :  { %v276_v24 = vld [vmem:[%s453_s4] ss:$0 sm:$0xff] }
   0x7   :  { %300 = vmatpush3.bf16.msra.mxu0 %v328_v2 }
   0x8   :  { %308 = vmatpush3.bf16.msra.mxu1 %v330_v7 }
   0x9   :  { %309 = vmatprep.subr.bf16.mxu1 %v337_v0 }
   0xa   :  { %302 = vmatmul.mubr.msk.bf16.vlgmr.msra.gmra.mrb[0].mxu0 %vm50_vm1, %v26_v6 }
   0xc   :  { %310 = vmatpush3.bf16.msra.mxu1 %v331_v8 }
   0xd   :  { %311 = vmatprep.subr.bf16.mxu1 %v337_v0 }
  0x10   :  { %312 = vmatpush3.bf16.msra.mxu1 %v332_v9 }
  0x11   :  { %313 = vmatprep.subr.bf16.mxu1 %v337_v0 }
  0x14   :  { %314 = vmatpush3.bf16.msra.mxu1 %v333_v10 }
  0x15   :  { %315 = vmatprep.subr.bf16.mxu1 %v337_v0 }
  0x18   :  { %316 = vmatpush3.bf16.msra.mxu1 %v334_v11 }
  0x19   :  { %317 = vmatprep.subr.bf16.mxu1 %v337_v0 }
  0x1c   :  { %318 = vmatpush3.bf16.msra.mxu1 %v335_v12 }
  0x1d   :  { %319 = vmatprep.subr.bf16.mxu1 %v337_v0 }
  0x20   :  { %320 = vmatpush3.bf16.msra.mxu1 %v336_v13 }
  0xdd   :  { %v88_v15 = vpop.f32.mrb[0].mxu0 }
  0xde   :  { %v89_v16 = vadd.f32 %v272_v14, %v88_v15  ;;  %v303_v17 = vpop.f32.mrb[1].mxu0 }
  0xdf   :  { %v91_v18 = vpop.f32.mrb[2].mxu0 }
  0xe0   :  { %v92_v19 = vadd.f32 %v272_v14, %v91_v18  ;;  %v304_v20 = vpop.f32.mrb[3].mxu0  ;;  %v95_v21 = vmax.f32 %v89_v16, 0.0 }
  0xe2   :  { %v96_v22 = vmax.f32 %v92_v19, 0.0 }
  0xe4   :  { %v97_v23 = vpack.c.bf16 %v96_v22, %v95_v21 }
  0xe6   :  { %322 = vmatmul.mubr.bf16.vlgmr.msra.gmra.mrb[0].mxu1 %v97_v23 }
 0x1b9   :  { %v203_v25 = vpop.f32.mrb[0].mxu1 }
 0x1ba   :  { %v204_v26 = vadd.f32 %v276_v24, %v203_v25  ;;  %v323_v27 = vpop.f32.mrb[1].mxu1 }
 0x1bb   :  { %v206_v28 = vpop.f32.mrb[2].mxu1 }
 0x1bc   :  { %211 = vst.msk [vmem:[%s454_s5] sm:$0xff] %vm210_vm2, %v204_v26  ;;  %v207_v29 = vadd.f32 %v276_v24, %v206_v28  ;;  %v324_v30 = vpop.f32.mrb[3].mxu1  ;;  %v213_v31 = vsel %vm210_vm2, %v204_v26, -inf }
 0x1bd   :  { %214 = vmax.xlane.f32.xlu0 %v213_v31 }
 0x1be   :  { %212 = vst.msk [vmem:[%s454_s5 + $0x8] sm:$0xff] %vm210_vm2, %v207_v29  ;;  %v216_v32 = vsel %vm210_vm2, %v207_v29, -inf }
 0x1c1   :  { %217 = vmax.xlane.f32.xlu0 %v216_v32 }
 0x24a   :  { %v215_v35 = vpop.xlane.xlu0 %214 }
 0x24b   :  { %220 = vst.msk [vmem:[%s455_s6] sm:$0xff] %vm219_vm3, %v215_v35  ;;  %vm224_vm4 = vcmp.eq.f32.partialorder %v204_v26, %v215_v35 }
 0x24c   :  { %v226_v36 = vsel %vm224_vm4, %v223_v34, 4 }
 0x24d   :  { %v228_v37 = vsel %vm210_vm2, %v226_v36, 2147483647 }
 0x24e   :  { %v218_v38 = vpop.xlane.xlu0 %217  ;;  %v230_v39 = vshra.s32 %v228_v37, 16  ;;  %v229_v45 = vand.u32 65535, %v228_v37 }
 0x24f   :  { %221 = vst.msk [vmem:[%s455_s6 + $0x8] sm:$0xff] %vm219_vm3, %v218_v38  ;;  %vm225_vm5 = vcmp.eq.f32.partialorder %v207_v29, %v218_v38 }
 0x250   :  { %v227_v40 = vsel %vm225_vm5, %v223_v34, 4  ;;  %v232_v41 = vcvt.s32.f32 %v230_v39  ;;  %v231_v47 = vcvt.s32.f32 %v229_v45 }
 0x251   :  { %v243_v42 = vsel %vm210_vm2, %v227_v40, 2147483647 }
 0x252   :  { %233 = vmin.xlane.f32.xlu1 %v232_v41  ;;  %v245_v43 = vshra.s32 %v243_v42, 16  ;;  %v244_v48 = vand.u32 65535, %v243_v42 }
 0x254   :  { %v247_v44 = vcvt.s32.f32 %v245_v43  ;;  %v246_v51 = vcvt.s32.f32 %v244_v48 }
 0x256   :  { %248 = vmin.xlane.f32.xlu1 %v247_v44 }
 0x2df   :  { %v234_v46 = vpop.xlane.xlu1 %233 }
 0x2e0   :  { %vm235_vm6 = vcmp.eq.f32.partialorder %v232_v41, %v234_v46  ;;  %v240_v53 = vcvt.f32.s32 %v234_v46 }
 0x2e1   :  { %v236_v49 = vsel %vm235_vm6, %v231_v47, inf }
 0x2e2   :  { %237 = vmin.xlane.f32.xlu0 %v236_v49  ;;  %v241_v55 = vshll.u32 %v240_v53, 16 }
 0x2e3   :  { %v249_v50 = vpop.xlane.xlu1 %248 }
 0x2e4   :  { %vm250_vm7 = vcmp.eq.f32.partialorder %v247_v44, %v249_v50  ;;  %v255_v56 = vcvt.f32.s32 %v249_v50 }
 0x2e5   :  { %v251_v52 = vsel %vm250_vm7, %v246_v51, inf }
 0x2e6   :  { %252 = vmin.xlane.f32.xlu1 %v251_v52  ;;  %v256_v60 = vshll.u32 %v255_v56, 16 }
 0x36f   :  { %v238_v54 = vpop.xlane.xlu0 %237 }
 0x370   :  { %v239_v57 = vcvt.f32.s32 %v238_v54 }
 0x372   :  { %v242_v58 = vadd.s32 %v241_v55, %v239_v57 }
 0x373   :  { %v253_v59 = vpop.xlane.xlu1 %252 }
 0x374   :  { %258 = vst.msk [vmem:[%s456_s7] sm:$0xff] %vm219_vm3, %v242_v58  ;;  %v254_v61 = vcvt.f32.s32 %v253_v59 }
 0x376   :  { %v257_v62 = vadd.s32 %v256_v60, %v254_v61 }
 0x378   :  { %259 = vst.msk [vmem:[%s456_s7 + $0x8] sm:$0xff] %vm219_vm3, %v257_v62 }

</bundles_post_ra>
